<compile_context>
chip_gen: v5e
topology: v5e:2x2
jax: 0.10.0
libtpu: 0.0.40
codegen_flags: <defaults>
</compile_context>

<pallas_src>
import jax
import jax.numpy as jnp
from jax.experimental import pallas as pl
from jax.experimental.pallas import tpu as pltpu

EPS = 1e-5
H1, H2, H3 = 128, 256, 256        # hidden sizes from the module __init__
LANE = 128                        # TPU lane width


def _round_up(n, m):
    return ((n + m - 1) // m) * m


# ----------------------------------------------------------------------------
# Kernel: 4 fused (matmul + bias + ReLU) stages over one batch tile.
# ----------------------------------------------------------------------------
def mlp_kernel(x_ref,
               w1_ref, b1_ref,
               w2_ref, b2_ref,
               w3_ref, b3_ref,
               w4_ref, b4_ref,
               o_ref):
    cd = w1_ref.dtype  # matmul-operand compute dtype (bf16 or f32)

    def lin_relu(h, w_ref, b_ref):
        # MXU matmul with f32 accumulation; bias + ReLU in f32 on the VPU;
        # cast back to the operand dtype for the next stage.
        z = jnp.dot(h, w_ref[...], preferred_element_type=jnp.float32) + b_ref[...]
        return jnp.maximum(z, 0.0).astype(cd)

    # x arrives in its original dtype (f32); cast in-kernel so the host never
    # materializes a padded/cast copy of x.
    h = x_ref[...].astype(cd)
    h = lin_relu(h, w1_ref, b1_ref)   # fc1 + bn1 (folded) + relu; dropout1 = id
    h = lin_relu(h, w2_ref, b2_ref)   # fc2 + bn2 (folded) + relu; dropout2 = id
    h = lin_relu(h, w3_ref, b3_ref)   # fc3 + bn3 (folded) + relu; dropout3 = id
    o_ref[...] = (jnp.dot(h, w4_ref[...], preferred_element_type=jnp.float32)
                  + b4_ref[...]).astype(o_ref.dtype)


# ----------------------------------------------------------------------------
# Host-side parameter folding (BN -> weights) + optional output-lane padding.
# ----------------------------------------------------------------------------
def _fold_params(params, compute_dtype, output_dim, out_cols):
    def fold(w, b, g, be, m, v):
        scale = g * jax.lax.rsqrt(v + EPS)          # (1, H)
        return w * scale, b * scale + (be - m * scale)

    w1, b1 = fold(params["w1"], params["b1"], params["g1"], params["be1"],
                  params["m1"], params["v1"])
    w2, b2 = fold(params["w2"], params["b2"], params["g2"], params["be2"],
                  params["m2"], params["v2"])
    w3, b3 = fold(params["w3"], params["b3"], params["g3"], params["be3"],
                  params["m3"], params["v3"])
    w4, b4 = params["w4"], params["b4"]

    if out_cols != output_dim:
        w4 = jnp.pad(w4, ((0, 0), (0, out_cols - output_dim)))
        b4 = jnp.pad(b4, ((0, 0), (0, out_cols - output_dim)))

    ws = [w.astype(compute_dtype) for w in (w1, w2, w3, w4)]
    bs = [b.astype(jnp.float32) for b in (b1, b2, b3, b4)]   # biases stay f32
    return ws, bs


# ----------------------------------------------------------------------------
# Wrapper: grid over batch only; weights/biases resident in VMEM.
# ----------------------------------------------------------------------------
def advanced_nn_forward(x, params, *, batch_tile=1024,
                        compute_dtype=jnp.bfloat16, out_dtype=jnp.float32):
    """x: (N, input_dim) float32; params: dict of weights (see init_params)."""
    N, input_dim = x.shape
    output_dim = params["w4"].shape[1]

    # Output lane handling: lane-dense padding only pays off for wide,
    # non-multiple-of-128 outputs.  Small outputs (<128) are written at their
    # true width (full-dim last block) to avoid inflated stores + slice pass.
    if output_dim % LANE == 0 or output_dim < LANE:
        out_cols = output_dim
    else:
        out_cols = _round_up(output_dim, LANE)

    ws, bs = _fold_params(params, compute_dtype, output_dim, out_cols)

    # Batch tile: align rows to the packed-vreg sublane count of the compute
    # dtype (bf16 vreg is [16,128]; f32 is [8,128]).
    row_align = 16 if jnp.dtype(compute_dtype).itemsize == 2 else 8
    tile = max(row_align, min(batch_tile, _round_up(N, row_align)))
    tile = _round_up(tile, row_align)
    # Guarantee >= 2 grid steps when the batch allows it, so the "parallel"
    # batch axis shards across both TensorCores on v7x (and the pipeline gets
    # real input/output DMA overlap on single-TC chips).
    if _round_up(N, tile) // tile < 2 and N > row_align:
        tile = max(row_align, _round_up(pl.cdiv(N, 2), row_align))
    n_pad = _round_up(N, tile)

    x_p = x if n_pad == N else jnp.pad(x, ((0, n_pad - N), (0, 0)))

    param_args = [ws[0], bs[0], ws[1], bs[1], ws[2], bs[2], ws[3], bs[3]]

    def full_spec(arr):
        # Whole-array block, replicated across the batch grid.  Default
        # double-buffering wastes ~0.4 MiB total here -- negligible.
        return pl.BlockSpec(arr.shape, lambda i: (0,) * arr.ndim)

    in_specs = [pl.BlockSpec((tile, input_dim), lambda i: (i, 0))]
    in_specs += [full_spec(p) for p in param_args]
    out_spec = pl.BlockSpec((tile, out_cols), lambda i: (i, 0))

    out = pl.pallas_call(
        mlp_kernel,
        out_shape=jax.ShapeDtypeStruct((n_pad, out_cols), out_dtype),
        grid_spec=pltpu.PrefetchScalarGridSpec(
            num_scalar_prefetch=0,
            grid=(n_pad // tile,),
            in_specs=in_specs,
            out_specs=out_spec,
        ),
        compiler_params=pltpu.CompilerParams(
            dimension_semantics=("parallel",)),
    )(x_p, *param_args)

    if n_pad != N or out_cols != output_dim:
        out = out[:N, :output_dim]
    return out


# ----------------------------------------------------------------------------
# Synthetic parameters (independent keys) and a pure-JAX f32 reference.
# ----------------------------------------------------------------------------
def init_params(key, input_dim, output_dim):
    ks = jax.random.split(key, 20)

    def linear(kw, kb, fan_in, fan_out):
        bound = 1.0 / jnp.sqrt(jnp.float32(fan_in))
        w = jax.random.uniform(kw, (fan_in, fan_out), jnp.float32, -bound, bound)
        b = jax.random.uniform(kb, (1, fan_out), jnp.float32, -bound, bound)
        return w, b

    def bn(kg, kb, km, kv, dim):
        g = 1.0 + 0.1 * jax.random.normal(kg, (1, dim), jnp.float32)
        be = 0.1 * jax.random.normal(kb, (1, dim), jnp.float32)
        m = 0.1 * jax.random.normal(km, (1, dim), jnp.float32)
        v = jax.random.uniform(kv, (1, dim), jnp.float32, 0.5, 1.5)
        return g, be, m, v

    p = {}
    p["w1"], p["b1"] = linear(ks[0], ks[1], input_dim, H1)
    p["g1"], p["be1"], p["m1"], p["v1"] = bn(ks[2], ks[3], ks[4], ks[5], H1)
    p["w2"], p["b2"] = linear(ks[6], ks[7], H1, H2)
    p["g2"], p["be2"], p["m2"], p["v2"] = bn(ks[8], ks[9], ks[10], ks[11], H2)
    p["w3"], p["b3"] = linear(ks[12], ks[13], H2, H3)
    p["g3"], p["be3"], p["m3"], p["v3"] = bn(ks[14], ks[15], ks[16], ks[17], H3)
    p["w4"], p["b4"] = linear(ks[18], ks[19], H3, output_dim)
    return p


def reference_forward(x, p):
    """Pure-JAX f32 reference (same eval-mode semantics as the PyTorch module)."""
    def lbr(h, w, b, g, be, m, v):
        z = h @ w + b
        scale = g * jax.lax.rsqrt(v + EPS)
        return jnp.maximum(z * scale + (be - m * scale), 0.0)

    h = lbr(x, p["w1"], p["b1"], p["g1"], p["be1"], p["m1"], p["v1"])
    h = lbr(h, p["w2"], p["b2"], p["g2"], p["be2"], p["m2"], p["v2"])
    h = lbr(h, p["w3"], p["b3"], p["g3"], p["be3"], p["m3"], p["v3"])
    return h @ p["w4"] + p["b4"]


# TODO(synk): training-mode BatchNorm (batch statistics) and stochastic
# Dropout are not implemented; this kernel covers the eval-mode forward only.

if __name__ == "__main__":
    key = jax.random.PRNGKey(0)
    k_x, k_p = jax.random.split(key)

    N, input_dim, output_dim = 16, 32, 16
    x = jax.random.normal(k_x, (N, input_dim), jnp.float32)
    params = init_params(k_p, input_dim, output_dim)

    ref = reference_forward(x, params)

    # Exact path (f32 matmul operands, f32 output): tight tolerance.
    out_f32 = advanced_nn_forward(x, params, compute_dtype=jnp.float32)
    out_f32 = jax.block_until_ready(out_f32)
    assert out_f32.shape == (N, output_dim)
    assert jnp.allclose(out_f32, ref, atol=1e-4, rtol=1e-4)

    # Default fast path (bf16 operands, f32 accumulation, f32 output).
    out_bf16 = advanced_nn_forward(x, params)
    out_bf16 = jax.block_until_ready(out_bf16)
    assert out_bf16.shape == (N, output_dim)
    assert jnp.allclose(out_bf16, ref, atol=5e-2, rtol=5e-2)

    # Bandwidth-optimized path for v6e/v7x (bf16 output stream).
    out_bf16o = advanced_nn_forward(x, params, out_dtype=jnp.bfloat16)
    out_bf16o = jax.block_until_ready(out_bf16o)
    assert out_bf16o.shape == (N, output_dim)
    assert jnp.allclose(out_bf16o.astype(jnp.float32), ref, atol=8e-2, rtol=8e-2)

    print("KERNEL_OK")
</pallas_src>

<mosaic_0001>
module attributes {stable_mosaic.version = 11 : i64} {
  func.func @mlp_kernel(%arg0: i32, %arg1: memref<8x32xf32, #tpu.memory_space<vmem>>, %arg2: memref<32x128xf32, #tpu.memory_space<vmem>>, %arg3: memref<1x128xf32, #tpu.memory_space<vmem>>, %arg4: memref<128x256xf32, #tpu.memory_space<vmem>>, %arg5: memref<1x256xf32, #tpu.memory_space<vmem>>, %arg6: memref<256x256xf32, #tpu.memory_space<vmem>>, %arg7: memref<1x256xf32, #tpu.memory_space<vmem>>, %arg8: memref<256x16xf32, #tpu.memory_space<vmem>>, %arg9: memref<1x16xf32, #tpu.memory_space<vmem>>, %arg10: memref<8x16xf32, #tpu.memory_space<vmem>>) attributes {dimension_semantics = [#tpu.dimension_semantics<parallel>], iteration_bounds = array<i64: 2>, scalar_prefetch = 0 : i64, scratch_operands = 0 : i64, tpu.core_type = #tpu.core_type<tc>, window_params = [{transform_indices = @transform_0, window_bounds = array<i64: 8, 32>}, {pipeline_mode = #tpu.pipeline_mode<synchronous>, transform_indices = @transform_1, window_bounds = array<i64: 32, 128>}, {pipeline_mode = #tpu.pipeline_mode<synchronous>, transform_indices = @transform_2, window_bounds = array<i64: 1, 128>}, {pipeline_mode = #tpu.pipeline_mode<synchronous>, transform_indices = @transform_3, window_bounds = array<i64: 128, 256>}, {pipeline_mode = #tpu.pipeline_mode<synchronous>, transform_indices = @transform_4, window_bounds = array<i64: 1, 256>}, {pipeline_mode = #tpu.pipeline_mode<synchronous>, transform_indices = @transform_5, window_bounds = array<i64: 256, 256>}, {pipeline_mode = #tpu.pipeline_mode<synchronous>, transform_indices = @transform_6, window_bounds = array<i64: 1, 256>}, {pipeline_mode = #tpu.pipeline_mode<synchronous>, transform_indices = @transform_7, window_bounds = array<i64: 256, 16>}, {pipeline_mode = #tpu.pipeline_mode<synchronous>, transform_indices = @transform_8, window_bounds = array<i64: 1, 16>}, {transform_indices = @transform_9, window_bounds = array<i64: 8, 16>}]} {
    %c0 = arith.constant 0 : index
    %c0_0 = arith.constant 0 : index
    %0 = vector.load %arg1[%c0, %c0_0] : memref<8x32xf32, #tpu.memory_space<vmem>>, vector<8x32xf32>
    %c0_1 = arith.constant 0 : index
    %c0_2 = arith.constant 0 : index
    %1 = vector.load %arg2[%c0_1, %c0_2] : memref<32x128xf32, #tpu.memory_space<vmem>>, vector<32x128xf32>
    %cst = arith.constant dense<0.000000e+00> : vector<8x128xf32>
    %2 = tpu.matmul %0, %1, %cst {dimension_numbers = #tpu.dot_dimension_numbers<[1], [0], [0], [1], [0, 0, 1, 1], [], []>} : vector<8x32xf32>, vector<32x128xf32>, vector<8x128xf32> -> vector<8x128xf32>
    %c0_3 = arith.constant 0 : index
    %c0_4 = arith.constant 0 : index
    %3 = vector.load %arg3[%c0_3, %c0_4] : memref<1x128xf32, #tpu.memory_space<vmem>>, vector<1x128xf32>
    %4 = vector.broadcast %3 : vector<1x128xf32> to vector<8x128xf32>
    %5 = arith.addf %2, %4 : vector<8x128xf32>
    %cst_5 = arith.constant 0.000000e+00 : f32
    %6 = vector.broadcast %cst_5 : f32 to vector<8x128xf32>
    %7 = arith.maximumf %5, %6 : vector<8x128xf32>
    %c0_6 = arith.constant 0 : index
    %c0_7 = arith.constant 0 : index
    %8 = vector.load %arg4[%c0_6, %c0_7] : memref<128x256xf32, #tpu.memory_space<vmem>>, vector<128x256xf32>
    %cst_8 = arith.constant dense<0.000000e+00> : vector<8x256xf32>
    %9 = tpu.matmul %7, %8, %cst_8 {dimension_numbers = #tpu.dot_dimension_numbers<[1], [0], [0], [1], [0, 0, 1, 1], [], []>} : vector<8x128xf32>, vector<128x256xf32>, vector<8x256xf32> -> vector<8x256xf32>
    %c0_9 = arith.constant 0 : index
    %c0_10 = arith.constant 0 : index
    %10 = vector.load %arg5[%c0_9, %c0_10] : memref<1x256xf32, #tpu.memory_space<vmem>>, vector<1x256xf32>
    %11 = vector.broadcast %10 : vector<1x256xf32> to vector<8x256xf32>
    %12 = arith.addf %9, %11 : vector<8x256xf32>
    %cst_11 = arith.constant 0.000000e+00 : f32
    %13 = vector.broadcast %cst_11 : f32 to vector<8x256xf32>
    %14 = arith.maximumf %12, %13 : vector<8x256xf32>
    %c0_12 = arith.constant 0 : index
    %c0_13 = arith.constant 0 : index
    %15 = vector.load %arg6[%c0_12, %c0_13] : memref<256x256xf32, #tpu.memory_space<vmem>>, vector<256x256xf32>
    %cst_14 = arith.constant dense<0.000000e+00> : vector<8x256xf32>
    %16 = tpu.matmul %14, %15, %cst_14 {dimension_numbers = #tpu.dot_dimension_numbers<[1], [0], [0], [1], [0, 0, 1, 1], [], []>} : vector<8x256xf32>, vector<256x256xf32>, vector<8x256xf32> -> vector<8x256xf32>
    %c0_15 = arith.constant 0 : index
    %c0_16 = arith.constant 0 : index
    %17 = vector.load %arg7[%c0_15, %c0_16] : memref<1x256xf32, #tpu.memory_space<vmem>>, vector<1x256xf32>
    %18 = vector.broadcast %17 : vector<1x256xf32> to vector<8x256xf32>
    %19 = arith.addf %16, %18 : vector<8x256xf32>
    %cst_17 = arith.constant 0.000000e+00 : f32
    %20 = vector.broadcast %cst_17 : f32 to vector<8x256xf32>
    %21 = arith.maximumf %19, %20 : vector<8x256xf32>
    %c0_18 = arith.constant 0 : index
    %c0_19 = arith.constant 0 : index
    %22 = vector.load %arg8[%c0_18, %c0_19] : memref<256x16xf32, #tpu.memory_space<vmem>>, vector<256x16xf32>
    %cst_20 = arith.constant dense<0.000000e+00> : vector<8x16xf32>
    %23 = tpu.matmul %21, %22, %cst_20 {dimension_numbers = #tpu.dot_dimension_numbers<[1], [0], [0], [1], [0, 0, 1, 1], [], []>} : vector<8x256xf32>, vector<256x16xf32>, vector<8x16xf32> -> vector<8x16xf32>
    %c0_21 = arith.constant 0 : index
    %c0_22 = arith.constant 0 : index
    %24 = vector.load %arg9[%c0_21, %c0_22] : memref<1x16xf32, #tpu.memory_space<vmem>>, vector<1x16xf32>
    %25 = vector.broadcast %24 : vector<1x16xf32> to vector<8x16xf32>
    %26 = arith.addf %23, %25 : vector<8x16xf32>
    %c0_23 = arith.constant 0 : index
    %c0_24 = arith.constant 0 : index
    %27 = vector.load %arg10[%c0_23, %c0_24] : memref<8x16xf32, #tpu.memory_space<vmem>>, vector<8x16xf32>
    tpu.vector_store %arg10[%c0_23, %c0_24], %26 {strides = array<i32>} : memref<8x16xf32, #tpu.memory_space<vmem>>, vector<8x16xf32>,
    return
  }
  func.func @transform_0(%arg0: i32) -> (i32, i32) {
    %c0_i32 = arith.constant 0 : i32
    %c0_i32_0 = arith.constant 0 : i32
    return %arg0, %c0_i32 : i32, i32
  }
  func.func @transform_1(%arg0: i32) -> (i32, i32) {
    %c0_i32 = arith.constant 0 : i32
    %c0_i32_0 = arith.constant 0 : i32
    %c0_i32_1 = arith.constant 0 : i32
    return %c0_i32, %c0_i32_0 : i32, i32
  }
  func.func @transform_2(%arg0: i32) -> (i32, i32) {
    %c0_i32 = arith.constant 0 : i32
    %c0_i32_0 = arith.constant 0 : i32
    %c0_i32_1 = arith.constant 0 : i32
    return %c0_i32, %c0_i32_0 : i32, i32
  }
  func.func @transform_3(%arg0: i32) -> (i32, i32) {
    %c0_i32 = arith.constant 0 : i32
    %c0_i32_0 = arith.constant 0 : i32
    %c0_i32_1 = arith.constant 0 : i32
    return %c0_i32, %c0_i32_0 : i32, i32
  }
  func.func @transform_4(%arg0: i32) -> (i32, i32) {
    %c0_i32 = arith.constant 0 : i32
    %c0_i32_0 = arith.constant 0 : i32
    %c0_i32_1 = arith.constant 0 : i32
    return %c0_i32, %c0_i32_0 : i32, i32
  }
  func.func @transform_5(%arg0: i32) -> (i32, i32) {
    %c0_i32 = arith.constant 0 : i32
    %c0_i32_0 = arith.constant 0 : i32
    %c0_i32_1 = arith.constant 0 : i32
    return %c0_i32, %c0_i32_0 : i32, i32
  }
  func.func @transform_6(%arg0: i32) -> (i32, i32) {
    %c0_i32 = arith.constant 0 : i32
    %c0_i32_0 = arith.constant 0 : i32
    %c0_i32_1 = arith.constant 0 : i32
    return %c0_i32, %c0_i32_0 : i32, i32
  }
  func.func @transform_7(%arg0: i32) -> (i32, i32) {
    %c0_i32 = arith.constant 0 : i32
    %c0_i32_0 = arith.constant 0 : i32
    %c0_i32_1 = arith.constant 0 : i32
    return %c0_i32, %c0_i32_0 : i32, i32
  }
  func.func @transform_8(%arg0: i32) -> (i32, i32) {
    %c0_i32 = arith.constant 0 : i32
    %c0_i32_0 = arith.constant 0 : i32
    %c0_i32_1 = arith.constant 0 : i32
    return %c0_i32, %c0_i32_0 : i32, i32
  }
  func.func @transform_9(%arg0: i32) -> (i32, i32) {
    %c0_i32 = arith.constant 0 : i32
    %c0_i32_0 = arith.constant 0 : i32
    return %arg0, %c0_i32 : i32, i32
  }
}

</mosaic_0001>

<bundles_post_ra>
// kernel: tpu_custom_call.1
= control target key start
LH: loop header
LB: loop body
LE: loop exit
PB: predicated region body
PF: predicated region fallthrough
CT: control target
= control target key end

     0   :  { %s1578_s0 = inlined_call_operand.hbm [shape: f32[16,32], index: 0, kind: input, shape index: {}]   ;;  %s1579_s1 = inlined_call_operand.vmem [shape: f32[32,128], index: 1, kind: input, shape index: {}]   ;;  %s1580_s2 = inlined_call_operand.hbm [shape: f32[1,128], index: 2, kind: input, shape index: {}]   ;;  %s1581_s3 = inlined_call_operand.vmem [shape: f32[128,256], index: 3, kind: input, shape index: {}]   ;;  %s1582_s4 = inlined_call_operand.vmem [shape: f32[1,256], index: 4, kind: input, shape index: {}]   ;;  %s1583_s5 = inlined_call_operand.hbm [shape: f32[256,256], index: 5, kind: input, shape index: {}]   ;;  %s1584_s6 = inlined_call_operand.hbm [shape: f32[1,256], index: 6, kind: input, shape index: {}]   ;;  %s1585_s7 = inlined_call_operand.vmem [shape: f32[256,16], index: 7, kind: input, shape index: {}]   ;;  %s1586_s8 = inlined_call_operand.vmem [shape: f32[1,16], index: 8, kind: input, shape index: {}]   ;;  %s1587_s9 = inlined_call_operand.hbm [shape: f32[16,16], index: 9, kind: output, shape index: {}]  }
   0x1   :  { %1588 = sst [smem:[#allocation15_spill]] %s1580_s2 }
   0x2   :  { %1589 = sst [smem:[#allocation16_spill]] %s1583_s5 }
   0x3   :  { %1590 = sst [smem:[#allocation17_spill]] %s1584_s6 }
   0x4   :  { %14 = vsyncpa [#allocation3], 0 }
   0x5   :  { %16 = vsyncpa [#allocation3 + $0x1], 0 }
   0x6   :  { %17 = vsyncpa [#allocation6], 0 }
   0x7   :  { %18 = vsyncpa [#allocation9], 0 }
   0x8   :  { %19 = vsyncpa [#allocation4], 0 }
   0x9   :  { %21 = vsyncpa [#allocation4 + $0x1], 0  ;;  %s1206_s30 = smov 0   ;;  %s1208_s10 = smov 0  }
   0xa   :  { %s1210_s11 = smov 0   ;;  %s1212_s12 = smov 0  }
   0xb LB: > { %s1227_s13 = sadd.s32 4294967295, %s1149_s12   ;;  %s855_s14 = sadd.s32 4294967294, %s1149_s12   ;;  %s1149_s12 = sphi %s1212_s12, %s1604_s12   ;;  %s1145_s11 = sphi %s1210_s11, %s1603_s11   ;;  %s1141_s10 = sphi %s1208_s10, %s1602_s10   ;;  %s1137_s30 = sphi %s1206_s30, %s1601_s30  }
   0xc   : > { %p47_p0 = scmp.ne.s32.totalorder %s1141_s10, %s1137_s30  ;;  %p48_p1 = scmp.eq.s32.totalorder %s1227_s13, 0 }
   0xd   : > { %p239_p2 = scmp.eq.s32.totalorder %s1227_s13, 1  ;;  %p245_p3 = scmp.eq.s32.totalorder %s855_s14, 1 }
   0xe   : > { %p1236_p4 = por %p48_p1, %p47_p0  ;;  %p856_p5 = scmp.ge.s32.totalorder %s1149_s12, 1 }
   0xf   : > { %p1241_p6 = por %p245_p3, %p47_p0  ;;  %p252_p7 = scmp.lt.s32.totalorder %s1149_s12, 3 }
  0x10   : > { %s1593_s2 = sld [smem:[#allocation15_spill]]  ;;  %s1151_s21 = smov [#allocation5]  }
  0x11   : > { %p1249_p8 = pnand %p856_p5, %p252_p7  ;;  %s269_s22 = sshll.u32 %s1151_s21, 4  ;;  %s270_s22 = int_to_ptr.vmem [resolvable:$true] %s269_s22 }
  0x12   : > { %s1595_s5 = sld [smem:[#allocation16_spill]]  ;;  %s1152_s27 = smov [#allocation7]  }
  0x13   : > { %p890_p10 = pneg %p1249_p8  ;;  %s286_s28 = sshll.u32 %s1152_s27, 4  ;;  %s287_s28 = int_to_ptr.vmem [resolvable:$true] %s286_s28 }
  0x14   : > { %s1153_s29 = smov 256   ;;  %s1154_s14 = smov 16  }
  0x15   : > { %p1261_p11 = pnand %p890_p10, %p48_p1  ;;  %s1597_s6 = sld [smem:[#allocation17_spill]] }
  0x16   : > { %s267_s19 = sshll.u32 %s1593_s2, 4  ;;  %s1155_s23 = smov [#allocation8]   ;;  %s268_s19 = int_to_ptr.hbm [resolvable:$true] %s267_s19 }
  0x17   : > { %893 = dma.hbm_to_vmem [thread:$0]  (!%p1261_p11), %s268_s19, 16, %s270_s22, [#allocation6]  }
  0x18   : > { %s284_s25 = sshll.u32 %s1595_s5, 4  ;;  %s301_s24 = sshll.u32 %s1155_s23, 4  ;;  %s285_s25 = int_to_ptr.hbm [resolvable:$true] %s284_s25  ;;  %s302_s24 = int_to_ptr.vmem [resolvable:$true] %s301_s24 }
  0x19   : > { %896 = dma.hbm_to_vmem [thread:$0]  (!%p1261_p11), %s285_s25, 8192, %s287_s28, [#allocation6], %s1153_s29, %s1153_s29, %s1154_s14  }
  0x1a   : > { %s1275_s19 = sadd.s32 1, %s1149_s12   ;;  %s34_s27 = sadd.s32 1, %s1145_s11 }
  0x1b   : > { %s299_s21 = sshll.u32 %s1597_s6, 4  ;;  %s31_s22 = ssub.s32 %s1149_s12, %s1275_s19  ;;  %s300_s21 = int_to_ptr.hbm [resolvable:$true] %s299_s21 }
  0x1c   : > { %899 = dma.hbm_to_vmem [thread:$0]  (!%p1261_p11), %s300_s21, 32, %s302_s24, [#allocation9]  }
  0x1d   : > { %p32_p12 = scmp.eq.s32.totalorder %s31_s22, 0  ;;  %p41_p13 = scmp.ne.s32.totalorder %s1145_s11, %s1141_s10 }
  0x1e   : > { %p42_p0 = scmp.eq.s32.totalorder %s1149_s12, 0  ;;  %p911_p5 = scmp.lt.s32.totalorder %s1149_s12, 2 }
  0x1f   : > { %s1284_s25 = scalar_select %p32_p12, %s1145_s11, %s34_s27  }
  0x20   : > { %p1288_p3 = por %p239_p2, %p41_p13  ;;  %s318_s29 = sand.u32 1, %s1145_s11  }
  0x21   : > { %s862_s14 = sshll.u32 %s1149_s12, 3  ;;  %p43_p7 = por %p42_p0, %p41_p13 }
  0x22   : > { %s861_s26 = sshll.u32 %s318_s29, 3  ;;  %s326_s21 = scalar_lea.hbm %s1578_s0, %s862_s14 }
  0x23   : > { %s328_s23 = sshll.u32 %s326_s21, 4  ;;  %s322_s24 = scalar_lea.vmem [#allocation2], %s861_s26  ;;  %s329_s23 = int_to_ptr.hbm [resolvable:$true] %s328_s23 }
  0x24   : > { %s330_s22 = sshll.u32 %s322_s24, 4  ;;  %p1298_p10 = pnand %p911_p5, %p43_p7  ;;  %s331_s22 = int_to_ptr.vmem [resolvable:$true] %s330_s22 }
  0x25   : > { %s319_s2 = scalar_lea.sflag [#allocation3], %s318_s29  ;;  %s1045_s5 = sshra.s32 %s329_s23, 4  ;;  %s1046_s5 = int_to_ptr.hbm [resolvable:$true] %s1045_s5 }
  0x26   : > { %s1047_s6 = scalar_lea.hbm %s1046_s5, 8  ;;  %p1049_p11 = pneg %p1298_p10 }
  0x27   : > { %p1048_p2 = scmp.ne.s32.totalorder %s1046_s5, %s1047_s6  ;;  %s1052_s26 = scalar_lea.hbm %s1578_s0, 16 }
  0x28   : > { %p1053_p0 = scmp.lt.s32.totalorder %s1046_s5, %s1578_s0  ;;  %p1054_p5 = scmp.lt.s32.totalorder %s1052_s26, %s1047_s6 }
  0x29   : > { %p1050_p12 = pnand %p1049_p11, %p1048_p2 }
  0x2a   : > { %p1055_p7 = por %p1054_p5, %p1053_p0 }
  0x2b   : > { %p1051_p13 = pneg %p1050_p12 }
  0x2d   : > { %p1056_p9 = pnand %p1055_p7, %p1051_p13 }
  0x2f   : > { %1059 = shalt.err (!%p1056_p9)
}
  0x30   : > { %903 = dma.hbm_to_vmem [thread:$0]  (!%p1298_p10), %s329_s23, 128, %s331_s22, %s319_s2  }
  0x31   : > { %339 = sbr.rel (%p1249_p8) target bundleno = 604 (0x25c), region = 56  ;;  %s1315_s29 = sand.u32 (!%p1249_p8), 1, %s1141_s10  }
  0x32   : > { %s864_s24 = sshll.u32 (!%p1249_p8), %s1315_s29, 3  ;;  %s342_s14 = scalar_lea.sflag (!%p1249_p8), [#allocation3], %s1315_s29 }
  0x33   : > { %s345_s5 = scalar_lea.vmem (!%p1249_p8), [#allocation2], %s864_s24 }
  0x36   : > { %1120 = dma.done.wait (%p1236_p4), %s342_s14, 128  }
  0x37   : > { %1122 = vsyncadd (%p1236_p4), %s342_s14, 4294967168 }
  0x38   : > { %1124 = dma.done.wait (%p48_p1), [#allocation6], 8208  }
  0x39   : > { %1126 = vsyncadd (%p48_p1), [#allocation6], 4294959088 }
  0x3a   : > { %1128 = dma.done.wait (%p48_p1), [#allocation9], 32  }
  0x3b   : > { %1130 = vsyncadd (%p48_p1), [#allocation9], 4294967264  ;;  %v400_v0 = vld [vmem:[%s1579_s1 + $0x18] sm:$0xff]  ;;  %v399_v1 = vld [vmem:[%s1579_s1 + $0x10] sm:$0xff]  ;;  %vm405_vm0 = vcmask 261120   ;;  %s871_s18 = sshll.u32 %s1227_s13, 3 }
  0x3c   : > { %421 = vmatpush.msra.mxu0 %v400_v0  ;;  %v398_v2 = vld [vmem:[%s1579_s1 + $0x8] sm:$0xff]  ;;  %v460_v3 = vld [vmem:[%s1581_s3 + $0xf0] sm:$0xff]  ;;  %v461_v4 = vld [vmem:[%s1581_s3 + $0xf8] sm:$0xff]  ;;  %s395_s20 = scalar_lea.vmem [#allocation10], %s864_s24  ;;  %vm738_vm1 = vcmask 130048   ;;  %s741_s13 = scalar_lea.sflag [#allocation4], %s1315_s29 }
  0x3d   : > { %468 = vmatpush.msra.mxu1 %v460_v3  ;;  %v458_v5 = vld [vmem:[%s1581_s3 + $0xe0] sm:$0xff]  ;;  %v459_v6 = vld [vmem:[%s1581_s3 + $0xe8] sm:$0xff]  ;;  %488 = vmatpush.msra.mxu2 %v461_v4  ;;  %v456_v7 = vld [vmem:[%s1581_s3 + $0xd0] sm:$0xff]  ;;  %s753_s23 = sshll.u32 %s395_s20, 4  ;;  %s1095_s24 = scalar_lea.hbm %s1587_s9, 16  ;;  %s754_s23 = int_to_ptr.vmem [resolvable:$true] %s753_s23 }
  0x3e   : > { %422 = vmatpush.msra.mxu0 %v399_v1  ;;  %v397_v8 = vld [vmem:[%s1579_s1] sm:$0xff]  ;;  %v457_v9 = vld [vmem:[%s1581_s3 + $0xd8] sm:$0xff]  ;;  %v455_v12 = vld [vmem:[%s1581_s3 + $0xc8] sm:$0xff] }
  0x3f   : > { %469 = vmatpush.msra.mxu1 %v458_v5  ;;  %v396_v10 = vld [vmem:[%s345_s5] sm:$0xff]  ;;  %489 = vmatpush.msra.mxu2 %v459_v6  ;;  %v452_v13 = vld [vmem:[%s1581_s3 + $0xb0] sm:$0xff]  ;;  %v453_v14 = vld [vmem:[%s1581_s3 + $0xb8] sm:$0xff]  ;;  %s751_s5 = scalar_lea.hbm %s1587_s9, %s871_s18 }
  0x40   : > { %423 = vmatpush.msra.mxu0 %v398_v2  ;;  %v454_v11 = vld [vmem:[%s1581_s3 + $0xc0] sm:$0xff]  ;;  %v451_v16 = vld [vmem:[%s1581_s3 + $0xa8] sm:$0xff]  ;;  %v448_v17 = vld [vmem:[%s1581_s3 + $0x90] sm:$0xff]  ;;  %s755_s15 = sshll.u32 %s751_s5, 4  ;;  %s756_s15 = int_to_ptr.hbm [resolvable:$true] %s755_s15 }
  0x41   : > { %470 = vmatpush.msra.mxu1 %v456_v7  ;;  %490 = vmatpush.msra.mxu2 %v457_v9  ;;  %v450_v15 = vld [vmem:[%s1581_s3 + $0xa0] sm:$0xff]  ;;  %v449_v18 = vld [vmem:[%s1581_s3 + $0x98] sm:$0xff]  ;;  %v447_v20 = vld [vmem:[%s1581_s3 + $0x88] sm:$0xff]  ;;  %s1089_s22 = sshra.s32 %s756_s15, 4  ;;  %s1090_s22 = int_to_ptr.hbm [resolvable:$true] %s1089_s22 }
  0x42   : > { %424 = vmatpush.msra.mxu0 %v397_v8  ;;  %v446_v19 = vld [vmem:[%s1581_s3 + $0x80] sm:$0xff]  ;;  %v444_v21 = vld [vmem:[%s1581_s3 + $0x70] sm:$0xff]  ;;  %v445_v22 = vld [vmem:[%s1581_s3 + $0x78] sm:$0xff]  ;;  %s1091_s27 = scalar_lea.hbm %s1090_s22, 8  ;;  %p1096_p9 = scmp.lt.s32.totalorder %s1090_s22, %s1587_s9 }
  0x43   : > { %869 = vmatmul.msk.f32.vlgmr.msra.gmra.mxu0 %vm405_vm0, %v396_v10  ;;  %471 = vmatpush.msra.mxu1 %v454_v11  ;;  %v442_v23 = vld [vmem:[%s1581_s3 + $0x60] sm:$0xff]  ;;  %v443_v24 = vld [vmem:[%s1581_s3 + $0x68] sm:$0xff]  ;;  %v440_v25 = vld [vmem:[%s1581_s3 + $0x50] sm:$0xff]  ;;  %p1092_p1 = scmp.ne.s32.totalorder %s1090_s22, %s1091_s27  ;;  %p1097_p10 = scmp.lt.s32.totalorder %s1095_s24, %s1091_s27 }
  0x44   : > { %491 = vmatpush.msra.mxu2 %v455_v12  ;;  %v441_v26 = vld [vmem:[%s1581_s3 + $0x58] sm:$0xff]  ;;  %v438_v27 = vld [vmem:[%s1581_s3 + $0x40] sm:$0xff]  ;;  %v439_v28 = vld [vmem:[%s1581_s3 + $0x48] sm:$0xff] }
  0x45   : > { %472 = vmatpush.msra.mxu1 %v452_v13  ;;  %v436_v29 = vld [vmem:[%s1581_s3 + $0x30] sm:$0xff]  ;;  %v437_v30 = vld [vmem:[%s1581_s3 + $0x38] sm:$0xff]  ;;  %v434_v31 = vld [vmem:[%s1581_s3 + $0x20] sm:$0xff]  ;;  %p1093_p4 = pnand %p1092_p1, %p1288_p3  ;;  %p1098_p2 = por %p1097_p10, %p1096_p9 }
  0x46   : > { %492 = vmatpush.msra.mxu2 %v453_v14  ;;  %v435_v32 = vld [vmem:[%s1581_s3 + $0x28] sm:$0xff]  ;;  %v432_v33 = vld [vmem:[%s1581_s3 + $0x10] sm:$0xff]  ;;  %v433_v34 = vld [vmem:[%s1581_s3 + $0x18] sm:$0xff] }
  0x47   : > { %473 = vmatpush.msra.mxu1 %v450_v15  ;;  %v430_v35 = vld [vmem:[%s1581_s3] sm:$0xff]  ;;  %v431_v36 = vld [vmem:[%s1581_s3 + $0x8] sm:$0xff]  ;;  %v538_v39 = vld [vmem:[#allocation7 + $0xe0] sm:$0xff]  ;;  %p1094_p8 = pneg %p1093_p4 }
  0x48   : > { %493 = vmatpush.msra.mxu2 %v451_v16  ;;  %v540_v37 = vld [vmem:[#allocation7 + $0xf0] sm:$0xff]  ;;  %v541_v38 = vld [vmem:[#allocation7 + $0xf8] sm:$0xff]  ;;  %v539_v40 = vld [vmem:[#allocation7 + $0xe8] sm:$0xff] }
  0x49   : > { %474 = vmatpush.msra.mxu1 %v448_v17  ;;  %580 = vmatpush.msra.mxu3 %v540_v37  ;;  %v536_v41 = vld [vmem:[#allocation7 + $0xd0] sm:$0xff]  ;;  %v537_v42 = vld [vmem:[#allocation7 + $0xd8] sm:$0xff]  ;;  %v570_v45 = vld [vmem:[#allocation7 + $0x1e0] sm:$0xff]  ;;  %p1099_p11 = pnand %p1098_p2, %p1094_p8 }
  0x4a   : > { %494 = vmatpush.msra.mxu2 %v449_v18  ;;  %v572_v43 = vld [vmem:[#allocation7 + $0x1f0] sm:$0xff]  ;;  %v573_v44 = vld [vmem:[#allocation7 + $0x1f8] sm:$0xff]  ;;  %v534_v46 = vld [vmem:[#allocation7 + $0xc0] sm:$0xff] }
  0x4b   : > { %475 = vmatpush.msra.mxu1 %v446_v19  ;;  %581 = vmatpush.msra.mxu3 %v538_v39  ;;  %v535_v47 = vld [vmem:[#allocation7 + $0xc8] sm:$0xff]  ;;  %v568_v49 = vld [vmem:[#allocation7 + $0x1d0] sm:$0xff]  ;;  %v569_v50 = vld [vmem:[#allocation7 + $0x1d8] sm:$0xff] }
  0x4c   : > { %495 = vmatpush.msra.mxu2 %v447_v20  ;;  %600 = vmatpush.msrb.mxu0 %v572_v43  ;;  %v571_v48 = vld [vmem:[#allocation7 + $0x1e8] sm:$0xff]  ;;  %v532_v51 = vld [vmem:[#allocation7 + $0xb0] sm:$0xff]  ;;  %v533_v52 = vld [vmem:[#allocation7 + $0xb8] sm:$0xff] }
  0x4d   : > { %476 = vmatpush.msra.mxu1 %v444_v21  ;;  %582 = vmatpush.msra.mxu3 %v536_v41  ;;  %v566_v53 = vld [vmem:[#allocation7 + $0x1c0] sm:$0xff]  ;;  %v567_v54 = vld [vmem:[#allocation7 + $0x1c8] sm:$0xff]  ;;  %v564_v57 = vld [vmem:[#allocation7 + $0x1b0] sm:$0xff] }
  0x4e   : > { %496 = vmatpush.msra.mxu2 %v445_v22  ;;  %601 = vmatpush.msrb.mxu0 %v570_v45  ;;  %v530_v55 = vld [vmem:[#allocation7 + $0xa0] sm:$0xff]  ;;  %v531_v56 = vld [vmem:[#allocation7 + $0xa8] sm:$0xff]  ;;  %v565_v58 = vld [vmem:[#allocation7 + $0x1b8] sm:$0xff] }
  0x4f   : > { %477 = vmatpush.msra.mxu1 %v442_v23  ;;  %583 = vmatpush.msra.mxu3 %v534_v46  ;;  %v528_v59 = vld [vmem:[#allocation7 + $0x90] sm:$0xff]  ;;  %v529_v60 = vld [vmem:[#allocation7 + $0x98] sm:$0xff]  ;;  %v562_v61 = vld [vmem:[#allocation7 + $0x1a0] sm:$0xff] }
  0x50   : > { %497 = vmatpush.msra.mxu2 %v443_v24  ;;  %602 = vmatpush.msrb.mxu0 %v568_v49  ;;  %v563_v62 = vld [vmem:[#allocation7 + $0x1a8] sm:$0xff]  ;;  %v526_v63 = vld [vmem:[#allocation7 + $0x80] sm:$0xff]  ;;  %v560_v1 = vld [vmem:[#allocation7 + $0x190] sm:$0xff] }
  0x51   : > { %478 = vmatpush.msra.mxu1 %v440_v25  ;;  %584 = vmatpush.msra.mxu3 %v532_v51  ;;  %v527_v0 = vld [vmem:[#allocation7 + $0x88] sm:$0xff]  ;;  %v561_v2 = vld [vmem:[#allocation7 + $0x198] sm:$0xff]  ;;  %v524_v3 = vld [vmem:[#allocation7 + $0x70] sm:$0xff] }
  0x52   : > { %498 = vmatpush.msra.mxu2 %v441_v26  ;;  %603 = vmatpush.msrb.mxu0 %v566_v53  ;;  %v525_v4 = vld [vmem:[#allocation7 + $0x78] sm:$0xff]  ;;  %v558_v5 = vld [vmem:[#allocation7 + $0x180] sm:$0xff]  ;;  %v559_v6 = vld [vmem:[#allocation7 + $0x188] sm:$0xff] }
  0x53   : > { %479 = vmatpush.msra.mxu1 %v438_v27  ;;  %585 = vmatpush.msra.mxu3 %v530_v55  ;;  %v522_v7 = vld [vmem:[#allocation7 + $0x60] sm:$0xff]  ;;  %v523_v8 = vld [vmem:[#allocation7 + $0x68] sm:$0xff]  ;;  %v556_v9 = vld [vmem:[#allocation7 + $0x170] sm:$0xff] }
  0x54   : > { %499 = vmatpush.msra.mxu2 %v439_v28  ;;  %604 = vmatpush.msrb.mxu0 %v564_v57  ;;  %v557_v10 = vld [vmem:[#allocation7 + $0x178] sm:$0xff]  ;;  %v520_v11 = vld [vmem:[#allocation7 + $0x50] sm:$0xff]  ;;  %v554_v13 = vld [vmem:[#allocation7 + $0x160] sm:$0xff] }
  0x55   : > { %480 = vmatpush.msra.mxu1 %v436_v29  ;;  %586 = vmatpush.msra.mxu3 %v528_v59  ;;  %v521_v12 = vld [vmem:[#allocation7 + $0x58] sm:$0xff]  ;;  %v555_v14 = vld [vmem:[#allocation7 + $0x168] sm:$0xff]  ;;  %v518_v15 = vld [vmem:[#allocation7 + $0x40] sm:$0xff] }
  0x56   : > { %500 = vmatpush.msra.mxu2 %v437_v30  ;;  %605 = vmatpush.msrb.mxu0 %v562_v61  ;;  %v519_v16 = vld [vmem:[#allocation7 + $0x48] sm:$0xff]  ;;  %v516_v17 = vld [vmem:[#allocation7 + $0x30] sm:$0xff]  ;;  %v517_v18 = vld [vmem:[#allocation7 + $0x38] sm:$0xff] }
  0x57   : > { %481 = vmatpush.msra.mxu1 %v434_v31  ;;  %587 = vmatpush.msra.mxu3 %v526_v63  ;;  %v953_v19 = vld [vmem:[#allocation5] ss:$0 sm:$0xff]  ;;  %v514_v23 = vld [vmem:[#allocation7 + $0x20] sm:$0xff]  ;;  %v552_v24 = vld [vmem:[#allocation7 + $0x150] sm:$0xff] }
  0x58   : > { %501 = vmatpush.msra.mxu2 %v435_v32  ;;  %606 = vmatpush.msrb.mxu0 %v560_v1  ;;  %v515_v25 = vld [vmem:[#allocation7 + $0x28] sm:$0xff]  ;;  %v553_v26 = vld [vmem:[#allocation7 + $0x158] sm:$0xff]  ;;  %v512_v27 = vld [vmem:[#allocation7 + $0x10] sm:$0xff] }
  0x59   : > { %482 = vmatpush.msra.mxu1 %v432_v33  ;;  %588 = vmatpush.msra.mxu3 %v524_v3  ;;  %v550_v28 = vld [vmem:[#allocation7 + $0x140] sm:$0xff]  ;;  %v513_v29 = vld [vmem:[#allocation7 + $0x18] sm:$0xff]  ;;  %v551_v30 = vld [vmem:[#allocation7 + $0x148] sm:$0xff] }
  0x5a   : > { %502 = vmatpush.msra.mxu2 %v433_v34  ;;  %607 = vmatpush.msrb.mxu0 %v558_v5  ;;  %v510_v31 = vld [vmem:[#allocation7] sm:$0xff]  ;;  %v548_v32 = vld [vmem:[#allocation7 + $0x130] sm:$0xff]  ;;  %v511_v33 = vld [vmem:[#allocation7 + $0x8] sm:$0xff] }
  0x5b   : > { %483 = vmatpush.msra.mxu1 %v430_v35  ;;  %589 = vmatpush.msra.mxu3 %v522_v7  ;;  %v549_v34 = vld [vmem:[#allocation7 + $0x138] sm:$0xff]  ;;  %v546_v35 = vld [vmem:[#allocation7 + $0x120] sm:$0xff]  ;;  %v544_v37 = vld [vmem:[#allocation7 + $0x110] sm:$0xff] }
  0x5c   : > { %503 = vmatpush.msra.mxu2 %v431_v36  ;;  %608 = vmatpush.msrb.mxu0 %v556_v9  ;;  %v547_v36 = vld [vmem:[#allocation7 + $0x128] sm:$0xff]  ;;  %v542_v39 = vld [vmem:[#allocation7 + $0x100] sm:$0xff]  ;;  %v675_v45 = vld [vmem:[%s1585_s7 + $0x68] sm:$0xff] }
  0x5d   : > { %620 = vmatpush.msrb.mxu1 %v541_v38  ;;  %590 = vmatpush.msra.mxu3 %v520_v11  ;;  %v545_v38 = vld [vmem:[#allocation7 + $0x118] sm:$0xff]  ;;  %v677_v41 = vld [vmem:[%s1585_s7 + $0x78] sm:$0xff]  ;;  %v670_v55 = vld [vmem:[%s1585_s7 + $0x40] sm:$0xff] }
  0x5e   : > { %640 = vmatpush.msrb.mxu2 %v573_v44  ;;  %609 = vmatpush.msrb.mxu0 %v554_v13  ;;  %v693_v43 = vld [vmem:[%s1585_s7 + $0xf8] sm:$0xff]  ;;  %v692_v44 = vld [vmem:[%s1585_s7 + $0xf0] sm:$0xff]  ;;  %v691_v46 = vld [vmem:[%s1585_s7 + $0xe8] sm:$0xff] }
  0x5f   : > { %621 = vmatpush.msrb.mxu1 %v539_v40  ;;  %591 = vmatpush.msra.mxu3 %v518_v15  ;;  %v543_v40 = vld [vmem:[#allocation7 + $0x108] sm:$0xff]  ;;  %v672_v51 = vld [vmem:[%s1585_s7 + $0x50] sm:$0xff]  ;;  %v671_v53 = vld [vmem:[%s1585_s7 + $0x48] sm:$0xff] }
  0x60   : > { %641 = vmatpush.msrb.mxu2 %v571_v48  ;;  %610 = vmatpush.msrb.mxu0 %v552_v24  ;;  %v690_v48 = vld [vmem:[%s1585_s7 + $0xe0] sm:$0xff]  ;;  %v673_v49 = vld [vmem:[%s1585_s7 + $0x58] sm:$0xff]  ;;  %v684_v7 = vld [vmem:[%s1585_s7 + $0xb0] sm:$0xff] }
  0x61   : > { %622 = vmatpush.msrb.mxu1 %v537_v42  ;;  %592 = vmatpush.msra.mxu3 %v516_v17  ;;  %v676_v42 = vld [vmem:[%s1585_s7 + $0x70] sm:$0xff]  ;;  %v462_v57 = vld [vmem:[%s1582_s4] sm:$0x3]  ;;  %v685_v5 = vld [vmem:[%s1585_s7 + $0xb8] sm:$0xff] }
  0x62   : > { %642 = vmatpush.msrb.mxu2 %v569_v50  ;;  %611 = vmatpush.msrb.mxu0 %v550_v28  ;;  %v689_v50 = vld [vmem:[%s1585_s7 + $0xd8] sm:$0xff]  ;;  %v686_v3 = vld [vmem:[%s1585_s7 + $0xc0] sm:$0xff]  ;;  %v683_v9 = vld [vmem:[%s1585_s7 + $0xa8] sm:$0xff] }
  0x63   : > { %623 = vmatpush.msrb.mxu1 %v535_v47  ;;  %593 = vmatpush.msra.mxu3 %v514_v23  ;;  %v674_v47 = vld [vmem:[%s1585_s7 + $0x60] sm:$0xff]  ;;  %v681_v13 = vld [vmem:[%s1585_s7 + $0x98] sm:$0xff]  ;;  %v680_v15 = vld [vmem:[%s1585_s7 + $0x90] sm:$0xff] }
  0x64   : > { %643 = vmatpush.msrb.mxu2 %v567_v54  ;;  %612 = vmatpush.msrb.mxu0 %v548_v32  ;;  %v687_v54 = vld [vmem:[%s1585_s7 + $0xc8] sm:$0xff]  ;;  %v682_v11 = vld [vmem:[%s1585_s7 + $0xa0] sm:$0xff] }
  0x65   : > { %624 = vmatpush.msrb.mxu1 %v533_v52  ;;  %594 = vmatpush.msra.mxu3 %v512_v27  ;;  %v688_v52 = vld [vmem:[%s1585_s7 + $0xd0] sm:$0xff]  ;;  %v678_v17 = vld [vmem:[%s1585_s7 + $0x80] sm:$0xff] }
  0x66   : > { %644 = vmatpush.msrb.mxu2 %v565_v58  ;;  %613 = vmatpush.msrb.mxu0 %v546_v35  ;;  %v464_v58 = vperm.slane %v462_v57, 0 }
  0x67   : > { %625 = vmatpush.msrb.mxu1 %v531_v56  ;;  %595 = vmatpush.msra.mxu3 %v510_v31  ;;  %v669_v56 = vld [vmem:[%s1585_s7 + $0x38] sm:$0xff]  ;;  %v954_v31 = vld [vmem:[%s1586_s8] ss:$0 sm:$0xff] }
  0x68   : > { %645 = vmatpush.msrb.mxu2 %v563_v62  ;;  %614 = vmatpush.msrb.mxu0 %v544_v37  ;;  %v465_v62 = vperm.slane %v462_v57, 1 }
  0x69   : > { %626 = vmatpush.msrb.mxu1 %v529_v60  ;;  %698 = vmatpush.msrb.mxu3 %v677_v41 }
  0x6a   : > { %646 = vmatpush.msrb.mxu2 %v561_v2  ;;  %615 = vmatpush.msrb.mxu0 %v542_v39  ;;  %v668_v2 = vld [vmem:[%s1585_s7 + $0x30] sm:$0xff] }
  0x6b   : > { %627 = vmatpush.msrb.mxu1 %v527_v0  ;;  %699 = vmatpush.msrb.mxu3 %v676_v42 }
  0x6c   : > { %647 = vmatpush.msrb.mxu2 %v559_v6  ;;  %718 = vmatpush.msra.mxu0 %v693_v43  ;;  %v666_v6 = vld [vmem:[%s1585_s7 + $0x20] sm:$0xff] }
  0x6d   : > { %628 = vmatpush.msrb.mxu1 %v525_v4  ;;  %700 = vmatpush.msrb.mxu3 %v675_v45  ;;  %v667_v4 = vld [vmem:[%s1585_s7 + $0x28] sm:$0xff] }
  0x6e   : > { %648 = vmatpush.msrb.mxu2 %v557_v10  ;;  %719 = vmatpush.msra.mxu0 %v692_v44  ;;  %v664_v10 = vld [vmem:[%s1585_s7 + $0x10] sm:$0xff] }
  0x6f   : > { %629 = vmatpush.msrb.mxu1 %v523_v8  ;;  %701 = vmatpush.msrb.mxu3 %v674_v47  ;;  %v665_v8 = vld [vmem:[%s1585_s7 + $0x18] sm:$0xff] }
  0x70   : > { %649 = vmatpush.msrb.mxu2 %v555_v14  ;;  %720 = vmatpush.msra.mxu0 %v691_v46  ;;  %v662_v14 = vld [vmem:[%s1585_s7] sm:$0xff] }
  0x71   : > { %630 = vmatpush.msrb.mxu1 %v521_v12  ;;  %702 = vmatpush.msrb.mxu3 %v673_v49  ;;  %v663_v12 = vld [vmem:[%s1585_s7 + $0x8] sm:$0xff] }
  0x72   : > { %650 = vmatpush.msrb.mxu2 %v553_v26  ;;  %721 = vmatpush.msra.mxu0 %v690_v48 }
  0x73   : > { %631 = vmatpush.msrb.mxu1 %v519_v16  ;;  %703 = vmatpush.msrb.mxu3 %v672_v51  ;;  %v679_v16 = vld [vmem:[%s1585_s7 + $0x88] sm:$0xff] }
  0x74   : > { %651 = vmatpush.msrb.mxu2 %v551_v30  ;;  %722 = vmatpush.msra.mxu0 %v689_v50 }
  0x75   : > { %632 = vmatpush.msrb.mxu1 %v517_v18  ;;  %704 = vmatpush.msrb.mxu3 %v671_v53  ;;  %v574_v18 = vld [vmem:[#allocation8] sm:$0x3] }
  0x76   : > { %652 = vmatpush.msrb.mxu2 %v549_v34  ;;  %723 = vmatpush.msra.mxu0 %v688_v52 }
  0x77   : > { %633 = vmatpush.msrb.mxu1 %v515_v25  ;;  %705 = vmatpush.msrb.mxu3 %v670_v55 }
  0x78   : > { %653 = vmatpush.msrb.mxu2 %v547_v36  ;;  %724 = vmatpush.msra.mxu0 %v687_v54 }
  0x79   : > { %634 = vmatpush.msrb.mxu1 %v513_v29  ;;  %706 = vmatpush.msrb.mxu3 %v669_v56 }
  0x7a   : > { %654 = vmatpush.msrb.mxu2 %v545_v38  ;;  %725 = vmatpush.msra.mxu0 %v686_v3 }
  0x7b   : > { %635 = vmatpush.msrb.mxu1 %v511_v33  ;;  %707 = vmatpush.msrb.mxu3 %v668_v2 }
  0x7c   : > { %655 = vmatpush.msrb.mxu2 %v543_v40  ;;  %726 = vmatpush.msra.mxu0 %v685_v5 }
  0x7d   : > { %708 = vmatpush.msrb.mxu3 %v667_v4 }
  0x7e   : > { %727 = vmatpush.msra.mxu0 %v684_v7 }
  0x7f   : > { %709 = vmatpush.msrb.mxu3 %v666_v6 }
  0x80   : > { %728 = vmatpush.msra.mxu0 %v683_v9 }
  0x81   : > { %710 = vmatpush.msrb.mxu3 %v665_v8 }
  0x82   : > { %729 = vmatpush.msra.mxu0 %v682_v11 }
  0x83   : > { %711 = vmatpush.msrb.mxu3 %v664_v10 }
  0x84   : > { %730 = vmatpush.msra.mxu0 %v681_v13 }
  0x85   : > { %712 = vmatpush.msrb.mxu3 %v663_v12 }
  0x86   : > { %731 = vmatpush.msra.mxu0 %v680_v15 }
  0x87   : > { %713 = vmatpush.msrb.mxu3 %v662_v14 }
  0x88   : > { %732 = vmatpush.msra.mxu0 %v679_v16 }
  0x8a   : > { %733 = vmatpush.msra.mxu0 %v678_v17 }
  0xc0   : > { %v426_v20 = vpop.f32.mrf.mxu0 }
  0xc1   : > { %v427_v21 = vadd.f32 %v953_v19, %v426_v20  ;;  %v576_v19 = vperm.slane %v574_v18, 0 }
  0xc3   : > { %v429_v22 = vmax.f32 %v427_v21, 0.0  ;;  %v577_v21 = vperm.slane %v574_v18, 1 }
  0xc5   : > { %484 = vmatmul.f32.vlgmr.msra.gmra.mxu1 %v429_v22  ;;  %504 = vmatmul.f32.vlgmr.msra.gmra.mxu2 %v429_v22 }
 0x142   : > { %v485_v59 = vpop.f32.mrf.mxu1 }
 0x143   : > { %v486_v60 = vadd.f32 %v485_v59, %v464_v58 }
 0x145   : > { %v508_v61 = vmax.f32 %v486_v60, 0.0 }
 0x147   : > { %596 = vmatmul.f32.vlgmr.msra.gmra.mxu3 %v508_v61  ;;  %636 = vmatmul.f32.vlgmr.msrb.gmra.mxu1 %v508_v61 }
 0x148   : > { %v505_v63 = vpop.f32.mrf.mxu2 }
 0x149   : > { %v506_v0 = vadd.f32 %v505_v63, %v465_v62 }
 0x14b   : > { %v509_v1 = vmax.f32 %v506_v0, 0.0 }
 0x14d   : > { %616 = vmatmul.f32.vlgmr.msrb.gmra.mxu0 %v509_v1  ;;  %656 = vmatmul.f32.vlgmr.msrb.gmra.mxu2 %v509_v1 }
 0x1c4   : > { %v637_v23 = vpop.f32.mrf.mxu1 }
 0x1c5   : > { %v638_v26 = vadd.f32 %v637_v23, %v577_v21 }
 0x1ca   : > { %v597_v20 = vpop.f32.mrf.mxu3  ;;  %v617_v24 = vpop.f32.mrf.mxu0 }
 0x1cb   : > { %v598_v22 = vadd.f32 %v597_v20, %v576_v19 }
 0x1cd   : > { %v618_v25 = vadd.f32 %v617_v24, %v598_v22 }
 0x1cf   : > { %v660_v27 = vmax.f32 %v618_v25, 0.0 }
 0x1d0   : > { %v657_v28 = vpop.f32.mrf.mxu2 }
 0x1d1   : > { %v658_v29 = vadd.f32 %v657_v28, %v638_v26  ;;  %714 = vmatmul.f32.vlgmr.msrb.gmra.mxu3 %v660_v27 }
 0x1d3   : > { %v661_v30 = vmax.f32 %v658_v29, 0.0 }
 0x1d5   : > { %734 = vmatmul.f32.vlgmr.msra.gmra.mxu0 %v661_v30 }
 0x252   : > { %v735_v34 = vpop.f32.mrf.mxu0 }
 0x254   : > { %v715_v32 = vpop.f32.mrf.mxu3 }
 0x255   : > { %v716_v33 = vadd.f32 %v954_v31, %v715_v32 }
 0x257   : > { %v736_v35 = vadd.f32 %v735_v34, %v716_v33 }
 0x259   : > { %739 = vst.msk [vmem:[%s395_s20] sm:$0xff] %vm738_vm1, %v736_v35 }
 0x25a   : > { %1102 = shalt.err (!%p1099_p11)
}
 0x25b   : > { %888 = dma.vmem_to_hbm [thread:$0]  (%p1288_p3), %s754_s23, 128, %s756_s15, %s741_s13  }
 0x25c PF: > { %s767_s29 = sand.u32 1, %s1137_s30   ;;  %p1600_p12 = scmp.ge.s32.totalorder %s1149_s12, 2 }
 0x25d   : > { %s768_s14 = scalar_lea.sflag [#allocation4], %s767_s29 }
 0x25e   : > { %p905_p13 = pnand %p1600_p12, %p1241_p6 }
 0x260   : > { %p906_p0 = pneg %p905_p13 }
 0x262   : > { %1132 = dma.done.wait (%p906_p0), %s768_s14, 128  }
 0x263   : > { %1134 = vsyncadd (%p906_p0), %s768_s14, 4294967168  ;;  %p24_p5 = scmp.ge.s32.totalorder %s1275_s19, 4   ;;  %s1601_s30 = smov %s1141_s10 }
 0x264   : > { %s1602_s10 = smov %s1145_s11  ;;  %s1603_s11 = smov %s1284_s25 }
 0x265   : > { %s1604_s12 = smov %s1275_s19  ;;  %26 = sbr.rel (!%p24_p5) target bundleno = 11 (0xb), region = 113 }
 0x26a   :  { %774 = vsyncpa [#allocation3], 1 }
 0x26b   :  { %776 = vsyncpa [#allocation3 + $0x1], 1 }
 0x26c   :  { %777 = vsyncpa [#allocation6], 1 }
 0x26d   :  { %778 = vsyncpa [#allocation9], 1 }
 0x26e   :  { %779 = vsyncpa [#allocation4], 1 }
 0x26f   :  { %781 = vsyncpa [#allocation4 + $0x1], 1 }

</bundles_post_ra>
